<compile_context>
chip_gen: v7x
topology: tpu7x:2x2x1
jax: 0.10.0
libtpu: 0.0.40
codegen_flags: <defaults>
</compile_context>

<pallas_src>
import functools

import jax
import jax.numpy as jnp
from jax.experimental import pallas as pl
from jax.experimental.pallas import tpu as pltpu

# ----------------------------- model sizes ---------------------------------
FEATURE_NUM = 32          # feature_num
N_ACTIONS = 8             # n_actions (first head)
HEAD2_DIM = 32            # second head (fixed 32 in the module)
HEAD_DIM = N_ACTIONS + HEAD2_DIM   # fused head width = 40
HIDDEN = 256
OUT_PAD = 128             # lane-dense packed output width


# ------------------------------ kernel --------------------------------------
def _actor_kernel(x_ref,
                  w1_ref, b1_ref,
                  w2_ref, b2_ref,
                  w3_ref, b3_ref,
                  wh_ref, bh_ref,
                  noise_ref,
                  out_ref,
                  *, deterministic: bool):
    # --- MLP trunk: 3x (Linear + ReLU). bf16 inputs on the MXU, f32 accum. ---
    h = jnp.dot(x_ref[...].astype(jnp.bfloat16), w1_ref[...],
                preferred_element_type=jnp.float32)
    h = jnp.maximum(h + b1_ref[...], 0.0)
    h = jnp.dot(h.astype(jnp.bfloat16), w2_ref[...],
                preferred_element_type=jnp.float32)
    h = jnp.maximum(h + b2_ref[...], 0.0)
    h = jnp.dot(h.astype(jnp.bfloat16), w3_ref[...],
                preferred_element_type=jnp.float32)
    h = jnp.maximum(h + b3_ref[...], 0.0)                     # (TM, 256) f32

    # --- fused action heads: one (256, 40) matmul, sliced per head -----------
    logits_all = jnp.dot(h.astype(jnp.bfloat16), wh_ref[...],
                         preferred_element_type=jnp.float32)
    logits_all = logits_all + bh_ref[...]                      # (TM, 40) f32

    def _head(logits, noise):
        a_dim = logits.shape[-1]
        # log_softmax (numerically stable)
        m = jnp.max(logits, axis=-1, keepdims=True)
        lse = m + jnp.log(jnp.sum(jnp.exp(logits - m), axis=-1, keepdims=True))
        logp = logits - lse                                    # (TM, A)

        if deterministic:
            score = logits                                     # dist.mode()
        else:
            score = logits + noise                             # Gumbel-max sample

        iota = jax.lax.broadcasted_iota(jnp.int32, logits.shape, 1)
        smax = jnp.max(score, axis=-1, keepdims=True)
        # first index attaining the max (matches torch argmax tie-breaking)
        idx = jnp.min(jnp.where(score == smax, iota, a_dim),
                      axis=-1, keepdims=True)                  # (TM, 1) int32
        lp = jnp.sum(jnp.where(iota == idx, logp, 0.0),
                     axis=-1, keepdims=True)                   # (TM, 1) f32
        return idx, lp

    a1, lp1 = _head(logits_all[:, :N_ACTIONS],
                    noise_ref[:, :N_ACTIONS])
    a2, lp2 = _head(logits_all[:, N_ACTIONS:HEAD_DIM],
                    noise_ref[:, N_ACTIONS:HEAD_DIM])

    # --- lane-dense packed output: col0/col1 = actions (as f32), col2 = logp --
    col = jax.lax.broadcasted_iota(jnp.int32, out_ref.shape, 1)
    packed = jnp.where(col == 0, a1.astype(jnp.float32),
             jnp.where(col == 1, a2.astype(jnp.float32),
             jnp.where(col == 2, lp1 + lp2, 0.0)))
    out_ref[...] = packed


# ------------------------------ wrapper --------------------------------------
def prepare_params(raw_params):
    """Fuse head weights and cast weights to bf16 (do once, reuse per call)."""
    w1, b1, w2, b2, w3, b3, wa1, ba1, wa2, ba2 = raw_params
    wh = jnp.concatenate([wa1, wa2], axis=1)                   # (256, 40)
    bh = jnp.concatenate([ba1, ba2], axis=1)                   # (1, 40)
    cast = lambda w: w.astype(jnp.bfloat16)
    return (cast(w1), b1.astype(jnp.float32),
            cast(w2), b2.astype(jnp.float32),
            cast(w3), b3.astype(jnp.float32),
            cast(wh), bh.astype(jnp.float32))


def _pick_tm(B):
    for tm in (256, 128, 64, 32, 16, 8):
        if B % tm == 0:
            return tm
    return B


def actor_forward(x, kparams, key, deterministic=False):
    """x: (B, FEATURE_NUM) f32; kparams: output of prepare_params; key: PRNGKey."""
    B = x.shape[0]
    TM = _pick_tm(B)
    grid = (B // TM,)

    if deterministic:
        noise = jnp.zeros((B, HEAD_DIM), jnp.float32)
    else:
        noise = jax.random.gumbel(key, (B, HEAD_DIM), jnp.float32)

    w1, b1, w2, b2, w3, b3, wh, bh = kparams
    kernel = functools.partial(_actor_kernel, deterministic=deterministic)

    def row_spec(last):
        return pl.BlockSpec((TM, last), lambda i: (i, 0))

    def const_spec(arr):
        shape = arr.shape
        return pl.BlockSpec(shape, lambda i: (0, 0))

    packed = pl.pallas_call(
        kernel,
        grid=grid,
        out_shape=jax.ShapeDtypeStruct((B, OUT_PAD), jnp.float32),
        in_specs=[
            row_spec(FEATURE_NUM),                 # x
            const_spec(w1), const_spec(b1),        # trunk weights stay resident
            const_spec(w2), const_spec(b2),
            const_spec(w3), const_spec(b3),
            const_spec(wh), const_spec(bh),        # fused head
            row_spec(HEAD_DIM),                    # Gumbel noise
        ],
        out_specs=pl.BlockSpec((TM, OUT_PAD), lambda i: (i, 0)),
        compiler_params=pltpu.CompilerParams(
            dimension_semantics=("parallel",)),
    )(x, w1, b1, w2, b2, w3, b3, wh, bh, noise)

    actions = packed[:, :2].astype(jnp.int32)                  # (B, 2)
    log_probs = packed[:, 2:3]                                 # (B, 1)
    return actions, log_probs


# --------------------------- deterministic init ------------------------------
def _init_params(key):
    def linear(key, fan_in, fan_out, gain=1.0):
        kw, _ = jax.random.split(key)
        bound = gain / jnp.sqrt(jnp.float32(fan_in))
        w = jax.random.uniform(kw, (fan_in, fan_out), jnp.float32, -bound, bound)
        b = jnp.zeros((1, fan_out), jnp.float32)
        return w, b

    ks = jax.random.split(key, 5)
    w1, b1 = linear(ks[0], FEATURE_NUM, HIDDEN)
    w2, b2 = linear(ks[1], HIDDEN, HIDDEN)
    w3, b3 = linear(ks[2], HIDDEN, HIDDEN)
    # Categorical heads use small-gain (0.01) init on their linear layer.
    wa1, ba1 = linear(ks[3], HIDDEN, N_ACTIONS, gain=0.01)
    wa2, ba2 = linear(ks[4], HIDDEN, HEAD2_DIM, gain=0.01)
    return (w1, b1, w2, b2, w3, b3, wa1, ba1, wa2, ba2)


# --------------------------------- main ---------------------------------------
if __name__ == "__main__":
    key = jax.random.PRNGKey(0)
    k_params, k_x, k_noise = jax.random.split(key, 3)

    B = 8
    x = jax.random.normal(k_x, (B, FEATURE_NUM), jnp.float32)
    raw_params = _init_params(k_params)
    kparams = prepare_params(raw_params)   # fuse heads + bf16 cast, done once

    # stochastic path (default forward: deterministic=False -> dist.sample())
    actions, log_probs = actor_forward(x, kparams, k_noise, deterministic=False)
    jax.block_until_ready((actions, log_probs))

    # deterministic path (dist.mode() == argmax of logits)
    actions_d, log_probs_d = actor_forward(x, kparams, k_noise, deterministic=True)
    jax.block_until_ready((actions_d, log_probs_d))

    assert actions.shape == (B, 2) and log_probs.shape == (B, 1)
    assert actions_d.shape == (B, 2) and log_probs_d.shape == (B, 1)
    assert actions.dtype == jnp.int32 and log_probs.dtype == jnp.float32
    print("KERNEL_OK")
</pallas_src>

<mosaic_0001>
module attributes {stable_mosaic.version = 11 : i64} {
  func.func @_actor_kernel(%arg0: i32, %arg1: memref<8x32xf32, #tpu.memory_space<vmem>>, %arg2: memref<32x256xbf16, #tpu.memory_space<vmem>>, %arg3: memref<1x256xf32, #tpu.memory_space<vmem>>, %arg4: memref<256x256xbf16, #tpu.memory_space<vmem>>, %arg5: memref<1x256xf32, #tpu.memory_space<vmem>>, %arg6: memref<256x256xbf16, #tpu.memory_space<vmem>>, %arg7: memref<1x256xf32, #tpu.memory_space<vmem>>, %arg8: memref<256x40xbf16, #tpu.memory_space<vmem>>, %arg9: memref<1x40xf32, #tpu.memory_space<vmem>>, %arg10: memref<8x40xf32, #tpu.memory_space<vmem>>, %arg11: memref<8x128xf32, #tpu.memory_space<vmem>>) attributes {dimension_semantics = [#tpu.dimension_semantics<parallel>], iteration_bounds = array<i64: 1>, scalar_prefetch = 0 : i64, scratch_operands = 0 : i64, tpu.core_type = #tpu.core_type<tc>, window_params = [{transform_indices = @transform_0, window_bounds = array<i64: 8, 32>}, {pipeline_mode = #tpu.pipeline_mode<synchronous>, transform_indices = @transform_1, window_bounds = array<i64: 32, 256>}, {pipeline_mode = #tpu.pipeline_mode<synchronous>, transform_indices = @transform_2, window_bounds = array<i64: 1, 256>}, {pipeline_mode = #tpu.pipeline_mode<synchronous>, transform_indices = @transform_3, window_bounds = array<i64: 256, 256>}, {pipeline_mode = #tpu.pipeline_mode<synchronous>, transform_indices = @transform_4, window_bounds = array<i64: 1, 256>}, {pipeline_mode = #tpu.pipeline_mode<synchronous>, transform_indices = @transform_5, window_bounds = array<i64: 256, 256>}, {pipeline_mode = #tpu.pipeline_mode<synchronous>, transform_indices = @transform_6, window_bounds = array<i64: 1, 256>}, {pipeline_mode = #tpu.pipeline_mode<synchronous>, transform_indices = @transform_7, window_bounds = array<i64: 256, 40>}, {pipeline_mode = #tpu.pipeline_mode<synchronous>, transform_indices = @transform_8, window_bounds = array<i64: 1, 40>}, {transform_indices = @transform_9, window_bounds = array<i64: 8, 40>}, {transform_indices = @transform_10, window_bounds = array<i64: 8, 128>}]} {
    %c0 = arith.constant 0 : index
    %c0_0 = arith.constant 0 : index
    %0 = vector.load %arg1[%c0, %c0_0] : memref<8x32xf32, #tpu.memory_space<vmem>>, vector<8x32xf32>
    %1 = arith.truncf %0 : vector<8x32xf32> to vector<8x32xbf16>
    %c0_1 = arith.constant 0 : index
    %c0_2 = arith.constant 0 : index
    %2 = vector.load %arg2[%c0_1, %c0_2] : memref<32x256xbf16, #tpu.memory_space<vmem>>, vector<32x256xbf16>
    %cst = arith.constant dense<0.000000e+00> : vector<8x256xf32>
    %3 = tpu.matmul %1, %2, %cst {dimension_numbers = #tpu.dot_dimension_numbers<[1], [0], [0], [1], [0, 0, 1, 1], [], []>} : vector<8x32xbf16>, vector<32x256xbf16>, vector<8x256xf32> -> vector<8x256xf32>
    %c0_3 = arith.constant 0 : index
    %c0_4 = arith.constant 0 : index
    %4 = vector.load %arg3[%c0_3, %c0_4] : memref<1x256xf32, #tpu.memory_space<vmem>>, vector<1x256xf32>
    %5 = vector.broadcast %4 : vector<1x256xf32> to vector<8x256xf32>
    %6 = arith.addf %3, %5 : vector<8x256xf32>
    %cst_5 = arith.constant 0.000000e+00 : f32
    %7 = vector.broadcast %cst_5 : f32 to vector<8x256xf32>
    %8 = arith.maximumf %6, %7 : vector<8x256xf32>
    %9 = arith.truncf %8 : vector<8x256xf32> to vector<8x256xbf16>
    %c0_6 = arith.constant 0 : index
    %c0_7 = arith.constant 0 : index
    %10 = vector.load %arg4[%c0_6, %c0_7] : memref<256x256xbf16, #tpu.memory_space<vmem>>, vector<256x256xbf16>
    %cst_8 = arith.constant dense<0.000000e+00> : vector<8x256xf32>
    %11 = tpu.matmul %9, %10, %cst_8 {dimension_numbers = #tpu.dot_dimension_numbers<[1], [0], [0], [1], [0, 0, 1, 1], [], []>} : vector<8x256xbf16>, vector<256x256xbf16>, vector<8x256xf32> -> vector<8x256xf32>
    %c0_9 = arith.constant 0 : index
    %c0_10 = arith.constant 0 : index
    %12 = vector.load %arg5[%c0_9, %c0_10] : memref<1x256xf32, #tpu.memory_space<vmem>>, vector<1x256xf32>
    %13 = vector.broadcast %12 : vector<1x256xf32> to vector<8x256xf32>
    %14 = arith.addf %11, %13 : vector<8x256xf32>
    %cst_11 = arith.constant 0.000000e+00 : f32
    %15 = vector.broadcast %cst_11 : f32 to vector<8x256xf32>
    %16 = arith.maximumf %14, %15 : vector<8x256xf32>
    %17 = arith.truncf %16 : vector<8x256xf32> to vector<8x256xbf16>
    %c0_12 = arith.constant 0 : index
    %c0_13 = arith.constant 0 : index
    %18 = vector.load %arg6[%c0_12, %c0_13] : memref<256x256xbf16, #tpu.memory_space<vmem>>, vector<256x256xbf16>
    %cst_14 = arith.constant dense<0.000000e+00> : vector<8x256xf32>
    %19 = tpu.matmul %17, %18, %cst_14 {dimension_numbers = #tpu.dot_dimension_numbers<[1], [0], [0], [1], [0, 0, 1, 1], [], []>} : vector<8x256xbf16>, vector<256x256xbf16>, vector<8x256xf32> -> vector<8x256xf32>
    %c0_15 = arith.constant 0 : index
    %c0_16 = arith.constant 0 : index
    %20 = vector.load %arg7[%c0_15, %c0_16] : memref<1x256xf32, #tpu.memory_space<vmem>>, vector<1x256xf32>
    %21 = vector.broadcast %20 : vector<1x256xf32> to vector<8x256xf32>
    %22 = arith.addf %19, %21 : vector<8x256xf32>
    %cst_17 = arith.constant 0.000000e+00 : f32
    %23 = vector.broadcast %cst_17 : f32 to vector<8x256xf32>
    %24 = arith.maximumf %22, %23 : vector<8x256xf32>
    %25 = arith.truncf %24 : vector<8x256xf32> to vector<8x256xbf16>
    %c0_18 = arith.constant 0 : index
    %c0_19 = arith.constant 0 : index
    %26 = vector.load %arg8[%c0_18, %c0_19] : memref<256x40xbf16, #tpu.memory_space<vmem>>, vector<256x40xbf16>
    %cst_20 = arith.constant dense<0.000000e+00> : vector<8x40xf32>
    %27 = tpu.matmul %25, %26, %cst_20 {dimension_numbers = #tpu.dot_dimension_numbers<[1], [0], [0], [1], [0, 0, 1, 1], [], []>} : vector<8x256xbf16>, vector<256x40xbf16>, vector<8x40xf32> -> vector<8x40xf32>
    %c0_21 = arith.constant 0 : index
    %c0_22 = arith.constant 0 : index
    %28 = vector.load %arg9[%c0_21, %c0_22] : memref<1x40xf32, #tpu.memory_space<vmem>>, vector<1x40xf32>
    %29 = vector.broadcast %28 : vector<1x40xf32> to vector<8x40xf32>
    %30 = arith.addf %27, %29 : vector<8x40xf32>
    %31 = vector.extract_strided_slice %30 {offsets = [0, 0], sizes = [8, 8], strides = [1, 1]} : vector<8x40xf32> to vector<8x8xf32>
    %c0_23 = arith.constant 0 : index
    %c0_24 = arith.constant 0 : index
    %32 = vector.load %arg10[%c0_23, %c0_24] : memref<8x40xf32, #tpu.memory_space<vmem>>, vector<8x8xf32>
    %cst_25 = arith.constant dense<0xFF800000> : vector<8xf32>
    %33 = vector.multi_reduction <maximumf>, %31, %cst_25 [1] : vector<8x8xf32> to vector<8xf32>
    %34 = vector.shape_cast %33 : vector<8xf32> to vector<8x1xf32>
    %35 = vector.broadcast %34 : vector<8x1xf32> to vector<8x8xf32>
    %36 = arith.subf %31, %35 : vector<8x8xf32>
    %37 = math.exp %36 : vector<8x8xf32>
    %cst_26 = arith.constant dense<0.000000e+00> : vector<8xf32>
    %38 = vector.multi_reduction <add>, %37, %cst_26 [1] : vector<8x8xf32> to vector<8xf32>
    %39 = vector.shape_cast %38 : vector<8xf32> to vector<8x1xf32>
    %40 = math.log %39 : vector<8x1xf32>
    %41 = arith.addf %34, %40 : vector<8x1xf32>
    %42 = vector.broadcast %41 : vector<8x1xf32> to vector<8x8xf32>
    %43 = arith.subf %31, %42 : vector<8x8xf32>
    %44 = arith.addf %31, %32 : vector<8x8xf32>
    %45 = tpu.iota {dimensions = array<i32: 1>} : vector<8x8xi32>
    %cst_27 = arith.constant dense<0xFF800000> : vector<8xf32>
    %46 = vector.multi_reduction <maximumf>, %44, %cst_27 [1] : vector<8x8xf32> to vector<8xf32>
    %47 = vector.shape_cast %46 : vector<8xf32> to vector<8x1xf32>
    %48 = vector.broadcast %47 : vector<8x1xf32> to vector<8x8xf32>
    %49 = arith.cmpf oeq, %44, %48 : vector<8x8xf32>
    %c8_i32 = arith.constant 8 : i32
    %50 = vector.broadcast %c8_i32 : i32 to vector<8x8xi32>
    %51 = arith.select %49, %45, %50 : vector<8x8xi1>, vector<8x8xi32>
    %cst_28 = arith.constant dense<2147483647> : vector<8xi32>
    %52 = vector.multi_reduction <minsi>, %51, %cst_28 [1] : vector<8x8xi32> to vector<8xi32>
    %53 = vector.shape_cast %52 : vector<8xi32> to vector<8x1xi32>
    %54 = vector.broadcast %53 : vector<8x1xi32> to vector<8x8xi32>
    %55 = arith.cmpi eq, %45, %54 : vector<8x8xi32>
    %cst_29 = arith.constant 0.000000e+00 : f32
    %56 = vector.broadcast %cst_29 : f32 to vector<8x8xf32>
    %57 = arith.select %55, %43, %56 : vector<8x8xi1>, vector<8x8xf32>
    %cst_30 = arith.constant dense<0.000000e+00> : vector<8xf32>
    %58 = vector.multi_reduction <add>, %57, %cst_30 [1] : vector<8x8xf32> to vector<8xf32>
    %59 = vector.shape_cast %58 : vector<8xf32> to vector<8x1xf32>
    %60 = vector.extract_strided_slice %30 {offsets = [0, 8], sizes = [8, 32], strides = [1, 1]} : vector<8x40xf32> to vector<8x32xf32>
    %c0_31 = arith.constant 0 : index
    %c8 = arith.constant 8 : index
    %61 = vector.load %arg10[%c0_31, %c8] : memref<8x40xf32, #tpu.memory_space<vmem>>, vector<8x32xf32>
    %cst_32 = arith.constant dense<0xFF800000> : vector<8xf32>
    %62 = vector.multi_reduction <maximumf>, %60, %cst_32 [1] : vector<8x32xf32> to vector<8xf32>
    %63 = vector.shape_cast %62 : vector<8xf32> to vector<8x1xf32>
    %64 = vector.broadcast %63 : vector<8x1xf32> to vector<8x32xf32>
    %65 = arith.subf %60, %64 : vector<8x32xf32>
    %66 = math.exp %65 : vector<8x32xf32>
    %cst_33 = arith.constant dense<0.000000e+00> : vector<8xf32>
    %67 = vector.multi_reduction <add>, %66, %cst_33 [1] : vector<8x32xf32> to vector<8xf32>
    %68 = vector.shape_cast %67 : vector<8xf32> to vector<8x1xf32>
    %69 = math.log %68 : vector<8x1xf32>
    %70 = arith.addf %63, %69 : vector<8x1xf32>
    %71 = vector.broadcast %70 : vector<8x1xf32> to vector<8x32xf32>
    %72 = arith.subf %60, %71 : vector<8x32xf32>
    %73 = arith.addf %60, %61 : vector<8x32xf32>
    %74 = tpu.iota {dimensions = array<i32: 1>} : vector<8x32xi32>
    %cst_34 = arith.constant dense<0xFF800000> : vector<8xf32>
    %75 = vector.multi_reduction <maximumf>, %73, %cst_34 [1] : vector<8x32xf32> to vector<8xf32>
    %76 = vector.shape_cast %75 : vector<8xf32> to vector<8x1xf32>
    %77 = vector.broadcast %76 : vector<8x1xf32> to vector<8x32xf32>
    %78 = arith.cmpf oeq, %73, %77 : vector<8x32xf32>
    %c32_i32 = arith.constant 32 : i32
    %79 = vector.broadcast %c32_i32 : i32 to vector<8x32xi32>
    %80 = arith.select %78, %74, %79 : vector<8x32xi1>, vector<8x32xi32>
    %cst_35 = arith.constant dense<2147483647> : vector<8xi32>
    %81 = vector.multi_reduction <minsi>, %80, %cst_35 [1] : vector<8x32xi32> to vector<8xi32>
    %82 = vector.shape_cast %81 : vector<8xi32> to vector<8x1xi32>
    %83 = vector.broadcast %82 : vector<8x1xi32> to vector<8x32xi32>
    %84 = arith.cmpi eq, %74, %83 : vector<8x32xi32>
    %cst_36 = arith.constant 0.000000e+00 : f32
    %85 = vector.broadcast %cst_36 : f32 to vector<8x32xf32>
    %86 = arith.select %84, %72, %85 : vector<8x32xi1>, vector<8x32xf32>
    %cst_37 = arith.constant dense<0.000000e+00> : vector<8xf32>
    %87 = vector.multi_reduction <add>, %86, %cst_37 [1] : vector<8x32xf32> to vector<8xf32>
    %88 = vector.shape_cast %87 : vector<8xf32> to vector<8x1xf32>
    %89 = tpu.iota {dimensions = array<i32: 1>} : vector<8x128xi32>
    %c0_i32 = arith.constant 0 : i32
    %90 = vector.broadcast %c0_i32 : i32 to vector<8x128xi32>
    %91 = arith.cmpi eq, %89, %90 : vector<8x128xi32>
    %92 = arith.sitofp %53 : vector<8x1xi32> to vector<8x1xf32>
    %c1_i32 = arith.constant 1 : i32
    %93 = vector.broadcast %c1_i32 : i32 to vector<8x128xi32>
    %94 = arith.cmpi eq, %89, %93 : vector<8x128xi32>
    %95 = arith.sitofp %82 : vector<8x1xi32> to vector<8x1xf32>
    %c2_i32 = arith.constant 2 : i32
    %96 = vector.broadcast %c2_i32 : i32 to vector<8x128xi32>
    %97 = arith.cmpi eq, %89, %96 : vector<8x128xi32>
    %98 = arith.addf %59, %88 : vector<8x1xf32>
    %cst_38 = arith.constant 0.000000e+00 : f32
    %99 = vector.shape_cast %98 : vector<8x1xf32> to vector<8x1xf32>
    %100 = vector.broadcast %99 : vector<8x1xf32> to vector<8x128xf32>
    %101 = vector.broadcast %cst_38 : f32 to vector<8x128xf32>
    %102 = arith.select %97, %100, %101 : vector<8x128xi1>, vector<8x128xf32>
    %103 = vector.shape_cast %95 : vector<8x1xf32> to vector<8x1xf32>
    %104 = vector.broadcast %103 : vector<8x1xf32> to vector<8x128xf32>
    %105 = arith.select %94, %104, %102 : vector<8x128xi1>, vector<8x128xf32>
    %106 = vector.shape_cast %92 : vector<8x1xf32> to vector<8x1xf32>
    %107 = vector.broadcast %106 : vector<8x1xf32> to vector<8x128xf32>
    %108 = arith.select %91, %107, %105 : vector<8x128xi1>, vector<8x128xf32>
    %c0_39 = arith.constant 0 : index
    %c0_40 = arith.constant 0 : index
    %109 = vector.load %arg11[%c0_39, %c0_40] : memref<8x128xf32, #tpu.memory_space<vmem>>, vector<8x128xf32>
    tpu.vector_store %arg11[%c0_39, %c0_40], %108 {strides = array<i32>} : memref<8x128xf32, #tpu.memory_space<vmem>>, vector<8x128xf32>,
    return
  }
  func.func @transform_0(%arg0: i32) -> (i32, i32) {
    %c0_i32 = arith.constant 0 : i32
    %c0_i32_0 = arith.constant 0 : i32
    return %arg0, %c0_i32 : i32, i32
  }
  func.func @transform_1(%arg0: i32) -> (i32, i32) {
    %c0_i32 = arith.constant 0 : i32
    %c0_i32_0 = arith.constant 0 : i32
    %c0_i32_1 = arith.constant 0 : i32
    return %c0_i32, %c0_i32_0 : i32, i32
  }
  func.func @transform_2(%arg0: i32) -> (i32, i32) {
    %c0_i32 = arith.constant 0 : i32
    %c0_i32_0 = arith.constant 0 : i32
    %c0_i32_1 = arith.constant 0 : i32
    return %c0_i32, %c0_i32_0 : i32, i32
  }
  func.func @transform_3(%arg0: i32) -> (i32, i32) {
    %c0_i32 = arith.constant 0 : i32
    %c0_i32_0 = arith.constant 0 : i32
    %c0_i32_1 = arith.constant 0 : i32
    return %c0_i32, %c0_i32_0 : i32, i32
  }
  func.func @transform_4(%arg0: i32) -> (i32, i32) {
    %c0_i32 = arith.constant 0 : i32
    %c0_i32_0 = arith.constant 0 : i32
    %c0_i32_1 = arith.constant 0 : i32
    return %c0_i32, %c0_i32_0 : i32, i32
  }
  func.func @transform_5(%arg0: i32) -> (i32, i32) {
    %c0_i32 = arith.constant 0 : i32
    %c0_i32_0 = arith.constant 0 : i32
    %c0_i32_1 = arith.constant 0 : i32
    return %c0_i32, %c0_i32_0 : i32, i32
  }
  func.func @transform_6(%arg0: i32) -> (i32, i32) {
    %c0_i32 = arith.constant 0 : i32
    %c0_i32_0 = arith.constant 0 : i32
    %c0_i32_1 = arith.constant 0 : i32
    return %c0_i32, %c0_i32_0 : i32, i32
  }
  func.func @transform_7(%arg0: i32) -> (i32, i32) {
    %c0_i32 = arith.constant 0 : i32
    %c0_i32_0 = arith.constant 0 : i32
    %c0_i32_1 = arith.constant 0 : i32
    return %c0_i32, %c0_i32_0 : i32, i32
  }
  func.func @transform_8(%arg0: i32) -> (i32, i32) {
    %c0_i32 = arith.constant 0 : i32
    %c0_i32_0 = arith.constant 0 : i32
    %c0_i32_1 = arith.constant 0 : i32
    return %c0_i32, %c0_i32_0 : i32, i32
  }
  func.func @transform_9(%arg0: i32) -> (i32, i32) {
    %c0_i32 = arith.constant 0 : i32
    %c0_i32_0 = arith.constant 0 : i32
    return %arg0, %c0_i32 : i32, i32
  }
  func.func @transform_10(%arg0: i32) -> (i32, i32) {
    %c0_i32 = arith.constant 0 : i32
    %c0_i32_0 = arith.constant 0 : i32
    return %arg0, %c0_i32 : i32, i32
  }
}

</mosaic_0001>

<bundles_post_ra>
// kernel: tpu_custom_call.1
= control target key start
LH: loop header
LB: loop body
LE: loop exit
PB: predicated region body
PF: predicated region fallthrough
CT: control target
= control target key end

     0   :  { %15 = vsyncpa [#allocation3], 0  ;;  %s1478_s0 = inlined_call_operand.vmem [shape: f32[8,32], index: 0, kind: input, shape index: {}]   ;;  %s1479_s1 = inlined_call_operand.vmem [shape: bf16[32,256], index: 1, kind: input, shape index: {}]   ;;  %s1480_s2 = inlined_call_operand.vmem [shape: f32[1,256], index: 2, kind: input, shape index: {}]   ;;  %s1481_s3 = inlined_call_operand.hbm [shape: bf16[256,256], index: 3, kind: input, shape index: {}]   ;;  %s1482_s4 = inlined_call_operand.vmem [shape: f32[1,256], index: 4, kind: input, shape index: {}]   ;;  %s1483_s5 = inlined_call_operand.hbm [shape: bf16[256,256], index: 5, kind: input, shape index: {}]   ;;  %s1484_s6 = inlined_call_operand.vmem [shape: f32[1,256], index: 6, kind: input, shape index: {}]   ;;  %s1485_s7 = inlined_call_operand.vmem [shape: bf16[256,40], index: 7, kind: input, shape index: {}]   ;;  %s1486_s8 = inlined_call_operand.vmem [shape: f32[1,40], index: 8, kind: input, shape index: {}]   ;;  %s1487_s9 = inlined_call_operand.vmem [shape: f32[8,40], index: 9, kind: input, shape index: {}]   ;;  %s1488_s10 = inlined_call_operand.hbm [shape: f32[8,128], index: 10, kind: output, shape index: {}]  }
   0x1   :  { %16 = vsyncpa [#allocation6], 0 }
   0x2   :  { %17 = vsyncpa [#allocation4], 0  ;;  %s1256_s13 = smov [#allocation2]   ;;  %s1184_s17 = scalar_lea.hbm %s1481_s3, 4096 }
   0x3   :  { %s29_s14 = sshll.u32 %s1256_s13, 4  ;;  %p1185_p0 = scmp.ne.s32.totalorder %s1481_s3, %s1184_s17  ;;  %s30_s14 = int_to_ptr.vmem [resolvable:$true] %s29_s14 }
   0x4   :  { %p1188_p1 = scmp.lt.u32.totalorder %s1184_s17, %s1481_s3 }
   0x6   :  { %p1190_p2 = pnand %p1188_p1, %p1185_p0 }
   0x8   :  { %1193 = shalt.err (!%p1190_p2)
}
   0x9   :  { %s1194_s22 = scalar_lea.vmem %s30_s14, 4096  ;;  %p1199_p4 = scmp.lt.s32.totalorder %s30_s14, %s30_s14 }
   0xa   :  { %p1195_p3 = scmp.ne.s32.totalorder %s30_s14, %s1194_s22  ;;  %p1200_p5 = scmp.lt.s32.totalorder %s1194_s22, %s1194_s22 }
   0xc   :  { %p1201_p6 = por %p1200_p5, %p1199_p4 }
   0xe   :  { %p1202_p7 = pnand %p1201_p6, %p1195_p3 }
  0x10   :  { %1205 = shalt.err (!%p1202_p7)
}
  0x11   :  { %s1257_s23 = smov 128   ;;  %s1258_s24 = smov 8  }
  0x12   :  { %35 = dma.hbm_to_vmem [thread:$0]  %s1481_s3, 4096, %s30_s14, [#allocation3], %s1257_s23, %s1257_s23, %s1258_s24  }
  0x13   :  { %s1259_s27 = smov [#allocation5]   ;;  %s1206_s11 = scalar_lea.hbm %s1483_s5, 4096 }
  0x14   :  { %s43_s28 = sshll.u32 %s1259_s27, 4  ;;  %p1207_p8 = scmp.ne.s32.totalorder %s1483_s5, %s1206_s11  ;;  %s44_s28 = int_to_ptr.vmem [resolvable:$true] %s43_s28 }
  0x15   :  { %p1210_p9 = scmp.lt.u32.totalorder %s1206_s11, %s1483_s5 }
  0x17   :  { %p1212_p10 = pnand %p1210_p9, %p1207_p8 }
  0x19   :  { %1215 = shalt.err (!%p1212_p10)
}
  0x1a   :  { %s1216_s17 = scalar_lea.vmem %s44_s28, 4096  ;;  %p1221_p12 = scmp.lt.s32.totalorder %s44_s28, %s44_s28 }
  0x1b   :  { %p1217_p11 = scmp.ne.s32.totalorder %s44_s28, %s1216_s17  ;;  %p1222_p13 = scmp.lt.s32.totalorder %s1216_s17, %s1216_s17 }
  0x1d   :  { %p1223_p0 = por %p1222_p13, %p1221_p12 }
  0x1f   :  { %p1224_p1 = pnand %p1223_p0, %p1217_p11 }
  0x21   :  { %1227 = shalt.err (!%p1224_p1)
}
  0x22   :  { %49 = dma.hbm_to_vmem [thread:$0]  %s1483_s5, 4096, %s44_s28, [#allocation6], %s1257_s23, %s1257_s23, %s1258_s24  }
  0x23   :  { %1250 = dma.done.wait [#allocation3], 4096  }
  0x24   :  { %1251 = vsyncadd [#allocation3], 4294963200 }
  0x25   :  { %1252 = dma.done.wait [#allocation6], 4096  }
  0x26   :  { %1253 = vsyncadd [#allocation6], 4294963200  ;;  %v1260_v0 = vmov 0   ;;  %v1058_v1 = vld [vmem:[%s1479_s1 + $0x4] ss:$8 sps:$4 sm:$0xff]   ;;  %vm103_vm0 = vcmask 261120  }
  0x27   :  { %139 = vmatprep.mubr.bf16.mxu0 %v1260_v0  ;;  %v1060_v2 = vld [vmem:[%s1479_s1] ss:$8 sps:$4 sm:$0xff]   ;;  %107 = vmatprep.subr.bf16.mxu0 %v1058_v1  ;;  %v1061_v3 = vld [vmem:[%s1479_s1 + $0x14] ss:$8 sps:$4 sm:$0xff]   ;;  %v1063_v4 = vld [vmem:[%s1479_s1 + $0x10] ss:$8 sps:$4 sm:$0xff]  }
  0x28   :  { %v65_v5 = vld [vmem:[%s1478_s0] sm:$0xff]  ;;  %108 = vmatpush1.bf16.msra.mxu0 %v1060_v2  ;;  %v1067_v8 = vld [vmem:[#allocation2 + $0x14] ss:$8 sps:$4 sm:$0xff]   ;;  %v1069_v10 = vld [vmem:[#allocation2 + $0x10] ss:$8 sps:$4 sm:$0xff]   ;;  %vm868_vm1 = vcmask 326720  }
  0x29   :  { %v1064_v6 = vld [vmem:[#allocation2 + $0x4] ss:$8 sps:$4 sm:$0xff]   ;;  %109 = vmatprep.subr.bf16.mxu0 %v1061_v3  ;;  %v1066_v7 = vld [vmem:[#allocation2] ss:$8 sps:$4 sm:$0xff]   ;;  %v66_v9 = vpack.c.bf16 %v65_v5, %v65_v5  ;;  %v1073_v13 = vld [vmem:[#allocation2 + $0x34] ss:$8 sps:$4 sm:$0xff]   ;;  %v73_v3 = vlaneseq }
  0x2a   :  { %356 = vmatprep.subr.bf16.mxu1 %v1064_v6  ;;  %v1070_v11 = vld [vmem:[#allocation2 + $0x24] ss:$8 sps:$4 sm:$0xff]   ;;  %v1072_v12 = vld [vmem:[#allocation2 + $0x20] ss:$8 sps:$4 sm:$0xff]   ;;  %v1075_v14 = vld [vmem:[#allocation2 + $0x30] ss:$8 sps:$4 sm:$0xff]  }
  0x2b   :  { %357 = vmatpush1.bf16.msra.mxu1 %v1066_v7  ;;  %v1076_v15 = vld [vmem:[#allocation2 + $0x44] ss:$8 sps:$4 sm:$0xff]   ;;  %v1078_v16 = vld [vmem:[#allocation2 + $0x40] ss:$8 sps:$4 sm:$0xff]   ;;  %v1079_v17 = vld [vmem:[#allocation2 + $0x54] ss:$8 sps:$4 sm:$0xff]  }
  0x2c   :  { %110 = vmatpush1.bf16.msra.mxu0 %v1063_v4  ;;  %358 = vmatprep.subr.bf16.mxu1 %v1067_v8  ;;  %v1081_v18 = vld [vmem:[#allocation2 + $0x50] ss:$8 sps:$4 sm:$0xff]   ;;  %v1082_v19 = vld [vmem:[#allocation2 + $0x64] ss:$8 sps:$4 sm:$0xff]   ;;  %v1084_v20 = vld [vmem:[#allocation2 + $0x60] ss:$8 sps:$4 sm:$0xff]  }
  0x2d   :  { %v1085_v21 = vld [vmem:[#allocation2 + $0x74] ss:$8 sps:$4 sm:$0xff]   ;;  %v1087_v22 = vld [vmem:[#allocation2 + $0x70] ss:$8 sps:$4 sm:$0xff]   ;;  %v1088_v23 = vld [vmem:[#allocation2 + $0x84] ss:$8 sps:$4 sm:$0xff]  }
  0x2e   :  { %v1090_v24 = vld [vmem:[#allocation2 + $0x80] ss:$8 sps:$4 sm:$0xff]   ;;  %v1091_v25 = vld [vmem:[#allocation2 + $0x94] ss:$8 sps:$4 sm:$0xff]   ;;  %v1093_v26 = vld [vmem:[#allocation2 + $0x90] ss:$8 sps:$4 sm:$0xff]  }
  0x2f   :  { %947 = vmatmul.mubr.msk.bf16.vlgmr.msra.gmra.mrb[0].mxu0 %vm103_vm0, %v66_v9  ;;  %359 = vmatpush1.bf16.msra.mxu1 %v1069_v10  ;;  %v1094_v27 = vld [vmem:[#allocation2 + $0xa4] ss:$8 sps:$4 sm:$0xff]   ;;  %v1096_v28 = vld [vmem:[#allocation2 + $0xa0] ss:$8 sps:$4 sm:$0xff]   ;;  %v1097_v29 = vld [vmem:[#allocation2 + $0xb4] ss:$8 sps:$4 sm:$0xff]  }
  0x30   :  { %360 = vmatprep.subr.bf16.mxu1 %v1070_v11  ;;  %v1099_v30 = vld [vmem:[#allocation2 + $0xb0] ss:$8 sps:$4 sm:$0xff]   ;;  %v1100_v31 = vld [vmem:[#allocation2 + $0xc4] ss:$8 sps:$4 sm:$0xff]   ;;  %v1102_v32 = vld [vmem:[#allocation2 + $0xc0] ss:$8 sps:$4 sm:$0xff]  }
  0x31   :  { %v1103_v33 = vld [vmem:[#allocation2 + $0xd4] ss:$8 sps:$4 sm:$0xff]   ;;  %v1105_v34 = vld [vmem:[#allocation2 + $0xd0] ss:$8 sps:$4 sm:$0xff]   ;;  %v1106_v35 = vld [vmem:[#allocation2 + $0xe4] ss:$8 sps:$4 sm:$0xff]  }
  0x32   :  { %v1108_v36 = vld [vmem:[#allocation2 + $0xe0] ss:$8 sps:$4 sm:$0xff]   ;;  %v1109_v37 = vld [vmem:[#allocation2 + $0xf4] ss:$8 sps:$4 sm:$0xff]   ;;  %v1111_v38 = vld [vmem:[#allocation2 + $0xf0] ss:$8 sps:$4 sm:$0xff]  }
  0x33   :  { %361 = vmatpush1.bf16.msra.mxu1 %v1072_v12  ;;  %v1112_v39 = vld [vmem:[#allocation5] ss:$8 sps:$4 sm:$0xff]   ;;  %v1114_v40 = vld [vmem:[#allocation5 + $0x4] ss:$8 sps:$4 sm:$0xff]   ;;  %v1117_v41 = vld [vmem:[#allocation5 + $0x14] ss:$8 sps:$4 sm:$0xff]  }
  0x34   :  { %362 = vmatprep.subr.bf16.mxu1 %v1073_v13  ;;  %605 = vmatprep.subr.bf16.mxu0 %v1114_v40  ;;  %v1115_v42 = vld [vmem:[#allocation5 + $0x10] ss:$8 sps:$4 sm:$0xff]   ;;  %v1120_v43 = vld [vmem:[#allocation5 + $0x24] ss:$8 sps:$4 sm:$0xff]   ;;  %v1118_v44 = vld [vmem:[#allocation5 + $0x20] ss:$8 sps:$4 sm:$0xff]  }
  0x35   :  { %606 = vmatpush1.bf16.msra.mxu0 %v1112_v39  ;;  %v1123_v45 = vld [vmem:[#allocation5 + $0x34] ss:$8 sps:$4 sm:$0xff]   ;;  %v1121_v46 = vld [vmem:[#allocation5 + $0x30] ss:$8 sps:$4 sm:$0xff]   ;;  %v1126_v47 = vld [vmem:[#allocation5 + $0x44] ss:$8 sps:$4 sm:$0xff]  }
  0x36   :  { %607 = vmatprep.subr.bf16.mxu0 %v1117_v41  ;;  %v1124_v48 = vld [vmem:[#allocation5 + $0x40] ss:$8 sps:$4 sm:$0xff]   ;;  %v1129_v49 = vld [vmem:[#allocation5 + $0x54] ss:$8 sps:$4 sm:$0xff]   ;;  %v1127_v50 = vld [vmem:[#allocation5 + $0x50] ss:$8 sps:$4 sm:$0xff]  }
  0x37   :  { %363 = vmatpush1.bf16.msra.mxu1 %v1075_v14  ;;  %v1132_v51 = vld [vmem:[#allocation5 + $0x64] ss:$8 sps:$4 sm:$0xff]   ;;  %v1130_v52 = vld [vmem:[#allocation5 + $0x60] ss:$8 sps:$4 sm:$0xff]   ;;  %v1135_v53 = vld [vmem:[#allocation5 + $0x74] ss:$8 sps:$4 sm:$0xff]  }
  0x38   :  { %364 = vmatprep.subr.bf16.mxu1 %v1076_v15  ;;  %v1133_v54 = vld [vmem:[#allocation5 + $0x70] ss:$8 sps:$4 sm:$0xff]   ;;  %v1138_v55 = vld [vmem:[#allocation5 + $0x84] ss:$8 sps:$4 sm:$0xff]   ;;  %v1136_v56 = vld [vmem:[#allocation5 + $0x80] ss:$8 sps:$4 sm:$0xff]  }
  0x39   :  { %608 = vmatpush1.bf16.msra.mxu0 %v1115_v42  ;;  %v1141_v57 = vld [vmem:[#allocation5 + $0x94] ss:$8 sps:$4 sm:$0xff]   ;;  %v1139_v58 = vld [vmem:[#allocation5 + $0x90] ss:$8 sps:$4 sm:$0xff]   ;;  %v1144_v59 = vld [vmem:[#allocation5 + $0xa4] ss:$8 sps:$4 sm:$0xff]  }
  0x3a   :  { %609 = vmatprep.subr.bf16.mxu0 %v1120_v43  ;;  %v1142_v60 = vld [vmem:[#allocation5 + $0xa0] ss:$8 sps:$4 sm:$0xff]   ;;  %v1147_v61 = vld [vmem:[#allocation5 + $0xb4] ss:$8 sps:$4 sm:$0xff]   ;;  %v1145_v62 = vld [vmem:[#allocation5 + $0xb0] ss:$8 sps:$4 sm:$0xff]  }
  0x3b   :  { %365 = vmatpush1.bf16.msra.mxu1 %v1078_v16  ;;  %v1150_v63 = vld [vmem:[#allocation5 + $0xc4] ss:$8 sps:$4 sm:$0xff]   ;;  %v1148_v0 = vld [vmem:[#allocation5 + $0xc0] ss:$8 sps:$4 sm:$0xff]   ;;  %v1153_v1 = vld [vmem:[#allocation5 + $0xd4] ss:$8 sps:$4 sm:$0xff]  }
  0x3c   :  { %366 = vmatprep.subr.bf16.mxu1 %v1079_v17  ;;  %v1151_v2 = vld [vmem:[#allocation5 + $0xd0] ss:$8 sps:$4 sm:$0xff]   ;;  %v74_v4 = vshrl.u32 %v73_v3, 7  ;;  %v71_v6 = vld [vmem:[%s1480_s2] sm:$0x3]  ;;  %vm826_vm2 = vcmask 64512  }
  0x3d   :  { %610 = vmatpush1.bf16.msra.mxu0 %v1118_v44 }
  0x3e   :  { %611 = vmatprep.subr.bf16.mxu0 %v1123_v45  ;;  %v1361_v5 = vsub.s32 0, %v74_v4  ;;  %v1366_v7 = vsub.s32 1, %v74_v4  ;;  %v1012_v4 = vld [vmem:[%s1486_s8] ss:$0 sm:$0xff]  ;;  %s1261_s8 = smov 120  }
  0x3f   :  { %367 = vmatpush1.bf16.msra.mxu1 %v1081_v18 }
  0x40   :  { %368 = vmatprep.subr.bf16.mxu1 %v1082_v19  ;;  %v76_v8 = vrot.slane %v71_v6, %v1361_v5  ;;  %v80_v9 = vrot.slane %v71_v6, %v1366_v7 }
  0x41   :  { %612 = vmatpush1.bf16.msra.mxu0 %v1121_v46 }
  0x42   :  { %613 = vmatprep.subr.bf16.mxu0 %v1126_v47 }
  0x43   :  { %369 = vmatpush1.bf16.msra.mxu1 %v1084_v20  ;;  %v1156_v20 = vld [vmem:[#allocation5 + $0xe4] ss:$8 sps:$4 sm:$0xff]  }
  0x44   :  { %370 = vmatprep.subr.bf16.mxu1 %v1085_v21  ;;  %v1154_v21 = vld [vmem:[#allocation5 + $0xe0] ss:$8 sps:$4 sm:$0xff]  }
  0x45   :  { %614 = vmatpush1.bf16.msra.mxu0 %v1124_v48 }
  0x46   :  { %615 = vmatprep.subr.bf16.mxu0 %v1129_v49  ;;  %v1172_v49 = vld [vmem:[%s1485_s7 + $0x70] sm:$0xff]  }
  0x47   :  { %371 = vmatpush1.bf16.msra.mxu1 %v1087_v22  ;;  %v1159_v22 = vld [vmem:[#allocation5 + $0xf4] ss:$8 sps:$4 sm:$0xff]  }
  0x48   :  { %372 = vmatprep.subr.bf16.mxu1 %v1088_v23  ;;  %v1157_v23 = vld [vmem:[#allocation5 + $0xf0] ss:$8 sps:$4 sm:$0xff]  }
  0x49   :  { %616 = vmatpush1.bf16.msra.mxu0 %v1127_v50  ;;  %v1173_v50 = vld [vmem:[%s1485_s7 + $0x30] sm:$0xff]  }
  0x4a   :  { %617 = vmatprep.subr.bf16.mxu0 %v1132_v51  ;;  %v1174_v51 = vld [vmem:[%s1485_s7 + $0x78] sm:$0xff]  }
  0x4b   :  { %373 = vmatpush1.bf16.msra.mxu1 %v1090_v24  ;;  %v1160_v24 = vld [vmem:[%s1485_s7 + $0x40] sm:$0xff]  }
  0x4c   :  { %374 = vmatprep.subr.bf16.mxu1 %v1091_v25  ;;  %v1161_v25 = vld [vmem:[%s1485_s7] sm:$0xff]  }
  0x4d   :  { %618 = vmatpush1.bf16.msra.mxu0 %v1130_v52  ;;  %v1175_v52 = vld [vmem:[%s1485_s7 + $0x38] sm:$0xff]  }
  0x4e   :  { %619 = vmatprep.subr.bf16.mxu0 %v1135_v53  ;;  %v433_v53 = vld [vmem:[%s1484_s6] sm:$0x3] }
  0x4f   :  { %375 = vmatpush1.bf16.msra.mxu1 %v1093_v26  ;;  %v1162_v26 = vld [vmem:[%s1485_s7 + $0x48] sm:$0xff]  }
  0x50   :  { %376 = vmatprep.subr.bf16.mxu1 %v1094_v27  ;;  %v1163_v27 = vld [vmem:[%s1485_s7 + $0x8] sm:$0xff]  }
  0x51   :  { %620 = vmatpush1.bf16.msra.mxu0 %v1133_v54  ;;  %v438_v54 = vrot.slane %v433_v53, %v1361_v5 }
  0x52   :  { %621 = vmatprep.subr.bf16.mxu0 %v1138_v55  ;;  %v442_v55 = vrot.slane %v433_v53, %v1366_v7 }
  0x53   :  { %377 = vmatpush1.bf16.msra.mxu1 %v1096_v28  ;;  %v1164_v28 = vld [vmem:[%s1485_s7 + $0x50] sm:$0xff]  }
  0x54   :  { %378 = vmatprep.subr.bf16.mxu1 %v1097_v29  ;;  %v1165_v29 = vld [vmem:[%s1485_s7 + $0x10] sm:$0xff]  }
  0x55   :  { %622 = vmatpush1.bf16.msra.mxu0 %v1136_v56 }
  0x56   :  { %623 = vmatprep.subr.bf16.mxu0 %v1141_v57 }
  0x57   :  { %379 = vmatpush1.bf16.msra.mxu1 %v1099_v30  ;;  %v1166_v30 = vld [vmem:[%s1485_s7 + $0x58] sm:$0xff]  }
  0x58   :  { %380 = vmatprep.subr.bf16.mxu1 %v1100_v31  ;;  %v1167_v31 = vld [vmem:[%s1485_s7 + $0x18] sm:$0xff]  }
  0x59   :  { %624 = vmatpush1.bf16.msra.mxu0 %v1139_v58 }
  0x5a   :  { %625 = vmatprep.subr.bf16.mxu0 %v1144_v59 }
  0x5b   :  { %381 = vmatpush1.bf16.msra.mxu1 %v1102_v32  ;;  %v1168_v32 = vld [vmem:[%s1485_s7 + $0x60] sm:$0xff]  }
  0x5c   :  { %382 = vmatprep.subr.bf16.mxu1 %v1103_v33  ;;  %v1169_v33 = vld [vmem:[%s1485_s7 + $0x20] sm:$0xff]  }
  0x5d   :  { %626 = vmatpush1.bf16.msra.mxu0 %v1142_v60 }
  0x5e   :  { %627 = vmatprep.subr.bf16.mxu0 %v1147_v61 }
  0x5f   :  { %383 = vmatpush1.bf16.msra.mxu1 %v1105_v34  ;;  %v1170_v34 = vld [vmem:[%s1485_s7 + $0x68] sm:$0xff]  }
  0x60   :  { %384 = vmatprep.subr.bf16.mxu1 %v1106_v35  ;;  %v1171_v35 = vld [vmem:[%s1485_s7 + $0x28] sm:$0xff]  }
  0x61   :  { %628 = vmatpush1.bf16.msra.mxu0 %v1145_v62 }
  0x62   :  { %629 = vmatprep.subr.bf16.mxu0 %v1150_v63 }
  0x63   :  { %385 = vmatpush1.bf16.msra.mxu1 %v1108_v36  ;;  %v184_v36 = vld [vmem:[%s1482_s4] sm:$0x3] }
  0x64   :  { %386 = vmatprep.subr.bf16.mxu1 %v1109_v37  ;;  %v189_v37 = vrot.slane %v184_v36, %v1361_v5 }
  0x65   :  { %630 = vmatpush1.bf16.msra.mxu0 %v1148_v0 }
  0x66   :  { %631 = vmatprep.subr.bf16.mxu0 %v1153_v1 }
  0x67   :  { %387 = vmatpush1.bf16.msra.mxu1 %v1111_v38  ;;  %v193_v38 = vrot.slane %v184_v36, %v1366_v7 }
  0x68   :  { %1029 = vmatprep.subr.bf16.mxu1 %v1160_v24 }
  0x69   :  { %632 = vmatpush1.bf16.msra.mxu0 %v1151_v2 }
  0x6a   :  { %633 = vmatprep.subr.bf16.mxu0 %v1156_v20 }
  0x6d   :  { %634 = vmatpush1.bf16.msra.mxu0 %v1154_v21 }
  0x6e   :  { %635 = vmatprep.subr.bf16.mxu0 %v1159_v22 }
  0x71   :  { %636 = vmatpush1.bf16.msra.mxu0 %v1157_v23 }
 0x102   :  { %v141_v10 = vpop.f32.mrb[0].mxu0 }
 0x103   :  { %v142_v11 = vadd.f32 %v141_v10, %v76_v8  ;;  %v143_v12 = vpop.f32.mrb[1].mxu0 }
 0x104   :  { %v144_v13 = vadd.f32 %v143_v12, %v80_v9  ;;  %v145_v14 = vpop.f32.mrb[2].mxu0  ;;  %v825_v9 = vld [vmem:[%s1487_s9] sm:$0xff]  ;;  %s1262_s9 = smov [#allocation7]  }
 0x105   :  { %v148_v15 = vmax.f32 %v142_v11, 0.0  ;;  %v146_v16 = vpop.f32.mrb[3].mxu0 }
 0x106   :  { %v149_v17 = vmax.f32 %v144_v13, 0.0 }
 0x107   :  { %v150_v19 = vpack.c.bf16 %v148_v15, %v148_v15  ;;  %v1442_v15 = vand.u32 127, %v73_v3 }
 0x108   :  { %v151_v18 = vpack.c.bf16 %v149_v17, %v149_v17 }
 0x109   :  { %vm921_vm9 = vcmp.eq.s32.totalorder %v1442_v15, 2  ;;  %vm919_vm10 = vcmp.eq.s32.totalorder %v1442_v15, 1  ;;  %vm917_vm11 = vcmp.eq.s32.totalorder %v1442_v15, 0 }
 0x10a   :  { %388 = vmatprep.mubr.bf16.mxu1 %v151_v18 }
 0x10b   :  { %389 = vmatmul.mubr.bf16.vlgmr.msra.gmra.mrb[0].mxu1 %v150_v19 }
 0x10c   :  { %1030 = vmatpush3.bf16.msra.mxu1 %v1161_v25 }
 0x10d   :  { %1031 = vmatprep.subr.bf16.mxu1 %v1162_v26 }
 0x110   :  { %1032 = vmatpush3.bf16.msra.mxu1 %v1163_v27 }
 0x111   :  { %1033 = vmatprep.subr.bf16.mxu1 %v1164_v28 }
 0x114   :  { %1034 = vmatpush3.bf16.msra.mxu1 %v1165_v29 }
 0x115   :  { %1035 = vmatprep.subr.bf16.mxu1 %v1166_v30 }
 0x118   :  { %1036 = vmatpush3.bf16.msra.mxu1 %v1167_v31 }
 0x119   :  { %1037 = vmatprep.subr.bf16.mxu1 %v1168_v32 }
 0x11c   :  { %1038 = vmatpush3.bf16.msra.mxu1 %v1169_v33 }
 0x11d   :  { %1039 = vmatprep.subr.bf16.mxu1 %v1170_v34 }
 0x120   :  { %1040 = vmatpush3.bf16.msra.mxu1 %v1171_v35 }
 0x121   :  { %1041 = vmatprep.subr.bf16.mxu1 %v1172_v49 }
 0x124   :  { %1042 = vmatpush3.bf16.msra.mxu1 %v1173_v50 }
 0x125   :  { %1043 = vmatprep.subr.bf16.mxu1 %v1174_v51 }
 0x128   :  { %1044 = vmatpush3.bf16.msra.mxu1 %v1175_v52 }
 0x1de   :  { %v390_v39 = vpop.f32.mrb[0].mxu1 }
 0x1df   :  { %v391_v40 = vadd.f32 %v390_v39, %v189_v37  ;;  %v392_v41 = vpop.f32.mrb[1].mxu1 }
 0x1e0   :  { %v393_v42 = vadd.f32 %v392_v41, %v193_v38  ;;  %v394_v43 = vpop.f32.mrb[2].mxu1 }
 0x1e1   :  { %v397_v44 = vmax.f32 %v391_v40, 0.0  ;;  %v395_v45 = vpop.f32.mrb[3].mxu1 }
 0x1e2   :  { %v398_v46 = vmax.f32 %v393_v42, 0.0 }
 0x1e3   :  { %v399_v48 = vpack.c.bf16 %v397_v44, %v397_v44 }
 0x1e4   :  { %v400_v47 = vpack.c.bf16 %v398_v46, %v398_v46 }
 0x1e6   :  { %637 = vmatprep.mubr.bf16.mxu0 %v400_v47 }
 0x1e7   :  { %638 = vmatmul.mubr.bf16.vlgmr.msra.gmra.mrb[4].mxu0 %v399_v48 }
 0x2ba   :  { %v639_v56 = vpop.f32.mrb[4].mxu0 }
 0x2bb   :  { %v640_v57 = vadd.f32 %v639_v56, %v438_v54  ;;  %v641_v58 = vpop.f32.mrb[5].mxu0 }
 0x2bc   :  { %v642_v59 = vadd.f32 %v641_v58, %v442_v55  ;;  %v643_v60 = vpop.f32.mrb[6].mxu0 }
 0x2bd   :  { %v646_v61 = vmax.f32 %v640_v57, 0.0  ;;  %v644_v62 = vpop.f32.mrb[7].mxu0 }
 0x2be   :  { %v647_v63 = vmax.f32 %v642_v59, 0.0 }
 0x2bf   :  { %v648_v1 = vpack.c.bf16 %v646_v61, %v646_v61 }
 0x2c0   :  { %v649_v0 = vpack.c.bf16 %v647_v63, %v647_v63 }
 0x2c2   :  { %817 = vmatprep.mubr.bf16.mxu1 %v649_v0 }
 0x2c3   :  { %818 = vmatmul.mubr.bf16.vlgmr.msra.gmra.mrb[4].mxu1 %v648_v1 }
 0x396   :  { %v1045_v2 = vpop.f32.mrb[4].mxu1 }
 0x397   :  { %v1046_v5 = vpop.f32.mrb[5].mxu1 }
 0x398   :  { %v1047_v6 = vadd.f32 %v1046_v5, %v1045_v2  ;;  %v1048_v7 = vpop.f32.mrb[6].mxu1 }
 0x399   :  { %v1049_v8 = vpop.f32.mrb[7].mxu1 }
 0x39a   :  { %v1434_v10 = vadd.f32 %v1047_v6, %v1012_v4 }
 0x39c   :  { %v869_v11 = vsel %vm868_vm1, %v1434_v10, -inf  ;;  %v840_v12 = vadd.f32 %v825_v9, %v1434_v10  ;;  %v827_v16 = vsel %vm826_vm2, %v1434_v10, -inf }
 0x39d   :  { %870 = vmax.xlane.f32.xlu0 %v869_v11 }
 0x39e   :  { %v886_v13 = vsel %vm868_vm1, %v840_v12, -inf  ;;  %v843_v14 = vsel %vm826_vm2, %v840_v12, -inf }
 0x39f   :  { %887 = vmax.xlane.f32.xlu1 %v886_v13 }
 0x3a1   :  { %844 = vmax.xlane.f32.xlu0 %v843_v14 }
 0x3b0   :  { %890 = vrot.lane.b32.xlu1 %v1442_v15, %s1258_s24  ;;  %s933_s24 = sshll.u32 %s1262_s9, 4  ;;  %s934_s24 = int_to_ptr.vmem [resolvable:$true] %s933_s24 }
 0x3b1   :  { %s1228_s19 = scalar_lea.vmem %s934_s24, 128  ;;  %p1233_p3 = scmp.lt.s32.totalorder %s934_s24, %s934_s24 }
 0x3b2   :  { %p1229_p2 = scmp.ne.s32.totalorder %s934_s24, %s1228_s19  ;;  %p1234_p4 = scmp.lt.s32.totalorder %s1228_s19, %s1228_s19 }
 0x3b4   :  { %p1235_p5 = por %p1234_p4, %p1233_p3 }
 0x3b6   :  { %p1236_p6 = pnand %p1235_p5, %p1229_p2 }
 0x3d4   :  { %828 = vmax.xlane.f32.xlu1 %v827_v16 }
 0x42a   :  { %v871_v17 = vpop.xlane.xlu0 %870 }
 0x42b   :  { %v872_v18 = vsub.f32 %v1434_v10, %v871_v17 }
 0x42c   :  { %v888_v19 = vpop.xlane.xlu1 %887 }
 0x42d   :  { %v873_v20 = vmul.f32 1.442695, %v872_v18  ;;  %vm889_vm3 = vcmp.eq.f32.partialorder %v840_v12, %v888_v19 }
 0x42e   :  { %v845_v26 = vpop.xlane.xlu0 %844 }
 0x42f   :  { %1176 = vpow2.f32 %v873_v20  ;;  %vm846_vm4 = vcmp.eq.f32.partialorder %v840_v12, %v845_v26 }
 0x430   :  { %v891_v21 = vpop.permute.xlu1 %890  ;;  %v847_v27 = vsel %vm846_vm4, %v1442_v15, 8 }
 0x431   :  { %v892_v22 = vsel %vm889_vm3, %v891_v21, 32  ;;  %v848_v28 = vsel %vm826_vm2, %v847_v27, 2147483647 }
 0x432   :  { %v893_v23 = vsel %vm868_vm1, %v892_v22, 2147483647  ;;  %v850_v29 = vshra.s32 %v848_v28, 16  ;;  %v849_v42 = vand.u32 65535, %v848_v28 }
 0x433   :  { %v895_v3 = vshra.s32 %v893_v23, 16  ;;  %v894_v38 = vand.u32 65535, %v893_v23 }
 0x434   :  { %v852_v30 = vcvt.s32.f32 %v850_v29  ;;  %v851_v44 = vcvt.s32.f32 %v849_v42 }
 0x435   :  { %v897_v24 = vcvt.s32.f32 %v895_v3  ;;  %v896_v40 = vcvt.s32.f32 %v894_v38 }
 0x437   :  { %898 = vmin.xlane.f32.xlu1 %v897_v24 }
 0x439   :  { %v1177_v25 = vpop.eup %1176 }
 0x43a   :  { %876 = vrot.lane.b32.xlu0 %v1177_v25, %s1261_s8 }
 0x459   :  { %853 = vmin.xlane.f32.xlu0 %v852_v30 }
 0x461   :  { %v829_v31 = vpop.xlane.xlu1 %828 }
 0x462   :  { %v830_v32 = vsub.f32 %v1434_v10, %v829_v31 }
 0x464   :  { %v831_v33 = vmul.f32 1.442695, %v830_v32 }
 0x466   :  { %1178 = vpow2.f32 %v831_v33 }
 0x470   :  { %v1179_v34 = vpop.eup %1178 }
 0x471   :  { %v833_v35 = vsel %vm826_vm2, %v1179_v34, 0.0 }
 0x472   :  { %834 = vadd.xlane.f32.xlu1 %v833_v35 }
 0x4ac   :  { %v877_v36 = vpop.permute.xlu0 %876 }
 0x4ad   :  { %v879_v37 = vsel %vm103_vm0, %v877_v36, 0.0 }
 0x4ae   :  { %880 = vadd.xlane.f32.xlu0 %v879_v37 }
 0x4c4   :  { %v899_v39 = vpop.xlane.xlu1 %898 }
 0x4c5   :  { %vm900_vm5 = vcmp.eq.f32.partialorder %v897_v24, %v899_v39  ;;  %v905_v0 = vcvt.f32.s32 %v899_v39 }
 0x4c6   :  { %v901_v41 = vsel %vm900_vm5, %v896_v40, inf }
 0x4c7   :  { %902 = vmin.xlane.f32.xlu1 %v901_v41  ;;  %v906_v2 = vshll.u32 %v905_v0, 16 }
 0x4e6   :  { %v854_v43 = vpop.xlane.xlu0 %853 }
 0x4e7   :  { %vm855_vm6 = vcmp.eq.f32.partialorder %v852_v30, %v854_v43  ;;  %v860_v54 = vcvt.f32.s32 %v854_v43 }
 0x4e8   :  { %v856_v45 = vsel %vm855_vm6, %v851_v44, inf }
 0x4e9   :  { %857 = vmin.xlane.f32.xlu0 %v856_v45  ;;  %v861_v57 = vshll.u32 %v860_v54, 16 }
 0x4ff   :  { %v835_v51 = vpop.xlane.xlu1 %834 }
 0x53b   :  { %v881_v46 = vpop.xlane.xlu0 %880 }
 0x53c   :  { %1180 = vlog2.f32 %v881_v46 }
 0x53d   :  { %1182 = vlog2.f32 %v835_v51 }
 0x546   :  { %v1181_v47 = vpop.eup %1180 }
 0x547   :  { %v883_v48 = vmul.f32 0.6931472, %v1181_v47  ;;  %v1183_v52 = vpop.eup %1182 }
 0x548   :  { %v837_v53 = vmul.f32 0.6931472, %v1183_v52 }
 0x549   :  { %v884_v49 = vadd.f32 %v883_v48, %v871_v17 }
 0x54a   :  { %v838_v55 = vadd.f32 %v837_v53, %v829_v31 }
 0x54b   :  { %v885_v50 = vsub.f32 %v1434_v10, %v884_v49 }
 0x54c   :  { %v839_v60 = vsub.f32 %v1434_v10, %v838_v55 }
 0x54d   :  { %910 = vrot.lane.b32.xlu0 %v885_v50, %s1261_s8 }
 0x554   :  { %v903_v63 = vpop.xlane.xlu1 %902 }
 0x555   :  { %v904_v1 = vcvt.f32.s32 %v903_v63 }
 0x557   :  { %v907_v4 = vadd.s32 %v906_v2, %v904_v1 }
 0x559   :  { %vm908_vm8 = vcmp.eq.s32.totalorder %v1442_v15, %v907_v4  ;;  %v920_v11 = vcvt.s32.f32 %v907_v4 }
 0x576   :  { %v858_v56 = vpop.xlane.xlu0 %857 }
 0x577   :  { %v859_v58 = vcvt.f32.s32 %v858_v56 }
 0x579   :  { %v862_v59 = vadd.s32 %v861_v57, %v859_v58 }
 0x57b   :  { %vm863_vm7 = vcmp.eq.s32.totalorder %v1442_v15, %v862_v59  ;;  %v918_v12 = vcvt.s32.f32 %v862_v59 }
 0x57c   :  { %v864_v61 = vsel %vm863_vm7, %v839_v60, 0.0 }
 0x57d   :  { %v865_v62 = vsel %vm826_vm2, %v864_v61, 0.0 }
 0x57e   :  { %866 = vadd.xlane.f32.xlu1 %v865_v62 }
 0x5bf   :  { %v911_v5 = vpop.permute.xlu0 %910 }
 0x5c0   :  { %v913_v6 = vsel %vm908_vm8, %v911_v5, 0.0 }
 0x5c1   :  { %v914_v7 = vsel %vm103_vm0, %v913_v6, 0.0 }
 0x5c2   :  { %915 = vadd.xlane.f32.xlu1 %v914_v7 }
 0x60b   :  { %v867_v8 = vpop.xlane.xlu1 %866 }
 0x64f   :  { %v916_v9 = vpop.xlane.xlu1 %915 }
 0x650   :  { %v922_v10 = vadd.f32 %v916_v9, %v867_v8 }
 0x652   :  { %v923_v13 = vsel %vm921_vm9, %v922_v10, 0.0 }
 0x653   :  { %v924_v14 = vsel %vm919_vm10, %v920_v11, %v923_v13 }
 0x654   :  { %v925_v16 = vsel %vm917_vm11, %v918_v12, %v924_v14 }
 0x655   :  { %926 = vst [vmem:[#allocation7] sm:$0xff] %v925_v16 }
 0x656   :  { %1239 = shalt.err (!%p1236_p6)
}
 0x657   :  { %s1240_s22 = scalar_lea.hbm %s1488_s10, 128 }
 0x658   :  { %p1241_p7 = scmp.ne.s32.totalorder %s1488_s10, %s1240_s22  ;;  %p1244_p8 = scmp.lt.u32.totalorder %s1240_s22, %s1488_s10 }
 0x65a   :  { %p1246_p9 = pnand %p1244_p8, %p1241_p7 }
 0x65c   :  { %1249 = shalt.err (!%p1246_p9)
}
 0x65d   :  { %936 = dma.vmem_to_hbm [thread:$0]  %s934_s24, 128, %s1488_s10, [#allocation4]  }
 0x65e   :  { %1254 = dma.done.wait [#allocation4], 128  }
 0x65f   :  { %1255 = vsyncadd [#allocation4], 4294967168 }
 0x660   :  { %940 = vsyncpa [#allocation3], 1 }
 0x661   :  { %941 = vsyncpa [#allocation6], 1 }
 0x662   :  { %942 = vsyncpa [#allocation4], 1 }

</bundles_post_ra>
